<compile_context>
chip_gen: v7x
topology: tpu7x:2x2x1
jax: 0.10.0
libtpu: 0.0.40
codegen_flags: <defaults>
</compile_context>

<pallas_src>
import jax
import jax.numpy as jnp
from jax.experimental import pallas as pl
from jax.experimental.pallas import tpu as pltpu


# ----------------------------------------------------------------------------
# Pallas copy kernel: whole-array HBM -> HBM async DMA (no grid, no VMEM tile).
# ----------------------------------------------------------------------------
def _dma_copy_kernel(x_ref, o_ref, sem):
    cp = pltpu.make_async_copy(x_ref, o_ref, sem)
    cp.start()
    cp.wait()


@jax.jit
def _dma_copy(x):
    """Bit-exact copy of x into a fresh buffer via a single HBM->HBM DMA."""
    return pl.pallas_call(
        _dma_copy_kernel,
        out_shape=jax.ShapeDtypeStruct(x.shape, x.dtype),
        in_specs=[pl.BlockSpec(memory_space=pl.ANY)],
        out_specs=pl.BlockSpec(memory_space=pl.ANY),
        scratch_shapes=[pltpu.SemaphoreType.DMA],
    )(x)


# Below this size, kernel launch overhead dwarfs the copy time: fall back to a
# plain XLA copy (review feedback).
_SMALL_COPY_BYTES = 2 << 20  # 2 MiB


def identity_copy(x, *, min_kernel_bytes=_SMALL_COPY_BYTES):
    """Materialized, bit-exact copy of x.

    Large tensors go through the Pallas HBM->HBM DMA kernel; small tensors use
    a plain XLA copy.  Shapes are static, so the branch is a Python decision.
    """
    nbytes = x.size * jnp.dtype(x.dtype).itemsize
    if nbytes < min_kernel_bytes:
        return jnp.copy(x)
    return _dma_copy(x)


# ----------------------------------------------------------------------------
# Forward pass — semantically identical to ResNet18_client_side.forward.
# ----------------------------------------------------------------------------
def resnet18_client_forward(x, Layer_Count=None, volly=None,
                            materialize_copy=False, min_kernel_bytes=None):
    """Equivalent to the PyTorch forward: returns (x, volly).

    The reference forward is a pure pass-through, so by default no kernel is
    launched and no HBM traffic is generated.  Set materialize_copy=True to
    produce a fresh, bit-exact copy of x (Pallas DMA kernel for large tensors,
    plain XLA copy below the size threshold).
    """
    if materialize_copy:
        kwargs = {}
        if min_kernel_bytes is not None:
            kwargs["min_kernel_bytes"] = min_kernel_bytes
        return identity_copy(x, **kwargs), volly
    return x, volly


if __name__ == "__main__":
    key = jax.random.PRNGKey(0)
    kx, _ = jax.random.split(key)

    # Small NCHW input consistent with the module (channels arg = 4 here).
    x = jax.random.normal(kx, (2, 4, 16, 16), jnp.float32)
    volly = {"tag": jnp.arange(8, dtype=jnp.int32)}

    # Default path: zero-cost pass-through (matches the PyTorch forward).
    out_fast, volly_fast = resnet18_client_forward(x, Layer_Count=[0, 6],
                                                   volly=volly)
    assert out_fast is x and volly_fast is volly

    # Kernel path: force the Pallas HBM->HBM DMA kernel even for this small
    # tensor (min_kernel_bytes=0 bypasses the small-copy fallback).
    out, volly_out = resnet18_client_forward(x, Layer_Count=[0, 6],
                                             volly=volly,
                                             materialize_copy=True,
                                             min_kernel_bytes=0)
    out = jax.block_until_ready(out)

    assert out.shape == x.shape and out.dtype == x.dtype
    assert bool(jnp.array_equal(out, x))
    assert volly_out is volly

    # Threshold path: small tensor takes the plain XLA copy, still bit-exact.
    out_small, _ = resnet18_client_forward(x, Layer_Count=[0, 6], volly=volly,
                                           materialize_copy=True)
    out_small = jax.block_until_ready(out_small)
    assert bool(jnp.array_equal(out_small, x))

    print("KERNEL_OK")
</pallas_src>

<mosaic_0001>
module attributes {stable_mosaic.version = 11 : i64} {
  func.func @_dma_copy_kernel(%arg0: memref<2x4x16x16xf32, #tpu.memory_space<any>>, %arg1: memref<2x4x16x16xf32, #tpu.memory_space<any>>, %arg2: memref<!tpu.dma_semaphore, #tpu.memory_space<semaphore_mem>>) attributes {dimension_semantics = [], scalar_prefetch = 0 : i64, scratch_operands = 1 : i64, tpu.core_type = #tpu.core_type<tc>} {
    tpu.enqueue_dma source(%arg0 : memref<2x4x16x16xf32, #tpu.memory_space<any>>) target(%arg1 : memref<2x4x16x16xf32, #tpu.memory_space<any>>) target_semaphore(%arg2 : memref<!tpu.dma_semaphore, #tpu.memory_space<semaphore_mem>>)
    tpu.wait_dma2 semaphore(%arg2 : memref<!tpu.dma_semaphore, #tpu.memory_space<semaphore_mem>>) src(%arg0 : memref<2x4x16x16xf32, #tpu.memory_space<any>>) dst(%arg1 : memref<2x4x16x16xf32, #tpu.memory_space<any>>)
    return
  }
}

</mosaic_0001>

<bundles_post_ra>
// kernel: _dma_copy.1
= control target key start
LH: loop header
LB: loop body
LE: loop exit
PB: predicated region body
PF: predicated region fallthrough
CT: control target
= control target key end

     0   :  { %s36_s6 = smov [#allocation2]   ;;  %s37_s7 = smov [#allocation3]   ;;  %s55_s0 = inlined_call_operand.hbm [shape: f32[2,4,16,16], index: 0, kind: input, shape index: {}]   ;;  %s56_s1 = inlined_call_operand.hbm [shape: f32[2,4,16,16], index: 1, kind: output, shape index: {}]  }
   0x1   :  { %s38_s8 = smov 0  }
   0x2   :  { %18 = dma.general %s55_s0, 2048, %s56_s1, %s36_s6, %s37_s7, [#allocation4], %s38_s8, 0  }
   0x3   :  { %34 = dma.done.wait [#allocation2], 2048 }
   0x4   :  { %35 = vsyncadd [#allocation2], 4294965248 }
   0x5   :  { %24 = vsyncmov [#allocation2] }
   0x8   :  { %s25_s13 = vpop.sfrf %24 }
   0x9   :  { %p30_p0 = scmp.ne.s32.totalorder %s25_s13, 0 }
   0xb   :  { %29 = shalt.err (%p30_p0)  }

</bundles_post_ra>
